<compile_context>
chip_gen: v7x
topology: tpu7x:2x2x1
jax: 0.10.0
libtpu: 0.0.40
codegen_flags: <defaults>
</compile_context>

<pallas_src>
import jax
import jax.numpy as jnp
from jax.experimental import pallas as pl
from jax.experimental.pallas import tpu as pltpu

IN_FEATURES = 16
OUT_FEATURES = 16
PACK = 8                      # rows of x packed into one 128-lane vreg row
LANES = PACK * IN_FEATURES    # 128
MAX_PACKED_ROW_TILE = 1024    # 1024 x 128 f32 = 512 KiB per tile buffer


def _packed_affine_kernel(x_ref, w_ref, b_ref, o_ref):
    # One MXU push ((tg,128) @ (128,128)) + one lane-dense VPU bias add per tile.
    o_ref[...] = (
        jnp.dot(x_ref[...], w_ref[...], preferred_element_type=jnp.float32)
        + b_ref[...]
    ).astype(o_ref.dtype)


def _choose_packed_tile(g):
    """Pick the packed-row tile: big (amortize ~0.35us/step), but keep >=2 grid
    steps when there is enough work so v7x's two TensorCores both get programs."""
    if g <= 2 * PACK:
        return g                              # tiny batch: one step, full-dim block
    half = -(-g // 2)                         # cdiv(g, 2)
    half = ((half + PACK - 1) // PACK) * PACK  # multiple of 8 (block-shape rule)
    return max(PACK, min(MAX_PACKED_ROW_TILE, half))


def _forward_impl(x, w1, b1, w2, b2, w3, b3):
    """x: [B, 16] float32. wN: [out, in] (torch layout). bN: [out]."""
    f32 = jnp.float32
    B = x.shape[0]

    # ---- algebraic folding of the three linears (exact linear algebra) ------
    # y = ((x @ W1^T + b1) @ W2^T + b2) @ W3^T + b3
    #   = x @ (W1^T W2^T W3^T) + ((b1 @ W2^T + b2) @ W3^T + b3)
    w1t = w1.T.astype(f32)
    w2t = w2.T.astype(f32)
    w3t = w3.T.astype(f32)
    w_eff = (w1t @ w2t) @ w3t                          # [16, 16]
    b_eff = (b1.astype(f32) @ w2t + b2) @ w3t + b3     # [16]

    # ---- 8-rows-per-vreg-row packing -----------------------------------------
    # Block-diagonal weight: 8 copies of w_eff on the diagonal -> (128, 128).
    w_bd = jnp.kron(jnp.eye(PACK, dtype=f32), w_eff)
    # Tiled bias: 8 copies of b_eff -> (1, 128).
    b_tiled = jnp.tile(b_eff, PACK).reshape(1, LANES)

    # Pad batch to a multiple of 8, then view as (G, 128) — free, row-major.
    Bp = ((B + PACK - 1) // PACK) * PACK
    xp = x.astype(f32)
    if Bp != B:
        xp = jnp.pad(xp, ((0, Bp - B), (0, 0)))
    x_packed = xp.reshape(Bp // PACK, LANES)
    G = Bp // PACK

    # ---- grid: weights/bias VMEM-resident (constant block index) -------------
    tg = _choose_packed_tile(G)
    grid = (pl.cdiv(G, tg),)

    out_packed = pl.pallas_call(
        _packed_affine_kernel,
        out_shape=jax.ShapeDtypeStruct((G, LANES), jnp.float32),
        grid=grid,
        in_specs=[
            pl.BlockSpec((tg, LANES), lambda i: (i, 0)),      # packed x rows
            pl.BlockSpec((LANES, LANES), lambda i: (0, 0)),   # block-diag W_eff
            pl.BlockSpec((1, LANES), lambda i: (0, 0)),       # tiled bias
        ],
        out_specs=pl.BlockSpec((tg, LANES), lambda i: (i, 0)),
        compiler_params=pltpu.CompilerParams(
            dimension_semantics=("parallel",),  # v7x: shard batch tiles across 2 TCs
        ),
    )(x_packed, w_bd, b_tiled)

    # Unpack: (G, 128) -> (Bp, 16) -> slice off padded rows. Free layout plumbing,
    # fused into this jit so it is not a separate dispatched pass.
    return out_packed.reshape(Bp, OUT_FEATURES)[:B].astype(x.dtype)


# Single jit: folding, packing, pallas_call, unpack all fused into one dispatch.
model_under_test_forward = jax.jit(_forward_impl)


if __name__ == "__main__":
    key = jax.random.PRNGKey(0)

    # Deterministic parameters matching the module's __init__ (torch [out, in] layout).
    w1 = jnp.full((OUT_FEATURES, IN_FEATURES), 1.0, dtype=jnp.float32)
    w2 = jnp.full((OUT_FEATURES, IN_FEATURES), 2.0, dtype=jnp.float32)
    w3 = jnp.full((OUT_FEATURES, IN_FEATURES), 3.0, dtype=jnp.float32)
    b1 = jnp.full((OUT_FEATURES,), 10.0, dtype=jnp.float32)
    b2 = jnp.full((OUT_FEATURES,), 20.0, dtype=jnp.float32)
    b3 = jnp.full((OUT_FEATURES,), 30.0, dtype=jnp.float32)

    def ref_fn(x):
        return ((x @ w1.T + b1) @ w2.T + b2) @ w3.T + b3

    # Primary run: batch = 8 (multiple of 8 -> exact packed path).
    batch = 8
    x = jax.random.normal(key, (batch, IN_FEATURES), dtype=jnp.float32)
    out = jax.block_until_ready(model_under_test_forward(x, w1, b1, w2, b2, w3, b3))
    ref = ref_fn(x)
    assert out.shape == (batch, OUT_FEATURES)
    # atol accounts only for f32 summation-order differences from the folding
    # (outputs are O(1e4); observed differences are O(1e-3)).
    assert jnp.allclose(out, ref, rtol=1e-5, atol=5e-2), "mismatch vs reference (B=8)"

    # Secondary run: batch not a multiple of 8 exercises the pad/slice path.
    batch2 = 13
    x2 = jax.random.normal(jax.random.PRNGKey(1), (batch2, IN_FEATURES), dtype=jnp.float32)
    out2 = jax.block_until_ready(model_under_test_forward(x2, w1, b1, w2, b2, w3, b3))
    assert out2.shape == (batch2, OUT_FEATURES)
    assert jnp.allclose(out2, ref_fn(x2), rtol=1e-5, atol=5e-2), "mismatch vs reference (B=13)"

    print("KERNEL_OK")
</pallas_src>

<mosaic_0001>
module attributes {stable_mosaic.version = 11 : i64} {
  func.func @_packed_affine_kernel(%arg0: i32, %arg1: memref<1x128xf32, #tpu.memory_space<vmem>>, %arg2: memref<128x128xf32, #tpu.memory_space<vmem>>, %arg3: memref<1x128xf32, #tpu.memory_space<vmem>>, %arg4: memref<1x128xf32, #tpu.memory_space<vmem>>) attributes {dimension_semantics = [#tpu.dimension_semantics<parallel>], iteration_bounds = array<i64: 1>, scalar_prefetch = 0 : i64, scratch_operands = 0 : i64, tpu.core_type = #tpu.core_type<tc>, window_params = [{transform_indices = @transform_0, window_bounds = array<i64: 1, 128>}, {pipeline_mode = #tpu.pipeline_mode<synchronous>, transform_indices = @transform_1, window_bounds = array<i64: 128, 128>}, {pipeline_mode = #tpu.pipeline_mode<synchronous>, transform_indices = @transform_2, window_bounds = array<i64: 1, 128>}, {transform_indices = @transform_3, window_bounds = array<i64: 1, 128>}]} {
    %c0 = arith.constant 0 : index
    %c0_0 = arith.constant 0 : index
    %0 = vector.load %arg1[%c0, %c0_0] : memref<1x128xf32, #tpu.memory_space<vmem>>, vector<1x128xf32>
    %c0_1 = arith.constant 0 : index
    %c0_2 = arith.constant 0 : index
    %1 = vector.load %arg2[%c0_1, %c0_2] : memref<128x128xf32, #tpu.memory_space<vmem>>, vector<128x128xf32>
    %cst = arith.constant dense<0.000000e+00> : vector<1x128xf32>
    %2 = tpu.matmul %0, %1, %cst {dimension_numbers = #tpu.dot_dimension_numbers<[1], [0], [0], [1], [0, 0, 1, 1], [], []>} : vector<1x128xf32>, vector<128x128xf32>, vector<1x128xf32> -> vector<1x128xf32>
    %c0_3 = arith.constant 0 : index
    %c0_4 = arith.constant 0 : index
    %3 = vector.load %arg3[%c0_3, %c0_4] : memref<1x128xf32, #tpu.memory_space<vmem>>, vector<1x128xf32>
    %4 = arith.addf %2, %3 : vector<1x128xf32>
    %c0_5 = arith.constant 0 : index
    %c0_6 = arith.constant 0 : index
    %5 = vector.load %arg4[%c0_5, %c0_6] : memref<1x128xf32, #tpu.memory_space<vmem>>, vector<1x128xf32>
    tpu.vector_store %arg4[%c0_5, %c0_6], %4 {strides = array<i32>} : memref<1x128xf32, #tpu.memory_space<vmem>>, vector<1x128xf32>,
    return
  }
  func.func @transform_0(%arg0: i32) -> (i32, i32) {
    %c0_i32 = arith.constant 0 : i32
    %c0_i32_0 = arith.constant 0 : i32
    return %arg0, %c0_i32 : i32, i32
  }
  func.func @transform_1(%arg0: i32) -> (i32, i32) {
    %c0_i32 = arith.constant 0 : i32
    %c0_i32_0 = arith.constant 0 : i32
    %c0_i32_1 = arith.constant 0 : i32
    return %c0_i32, %c0_i32_0 : i32, i32
  }
  func.func @transform_2(%arg0: i32) -> (i32, i32) {
    %c0_i32 = arith.constant 0 : i32
    %c0_i32_0 = arith.constant 0 : i32
    %c0_i32_1 = arith.constant 0 : i32
    return %c0_i32, %c0_i32_0 : i32, i32
  }
  func.func @transform_3(%arg0: i32) -> (i32, i32) {
    %c0_i32 = arith.constant 0 : i32
    %c0_i32_0 = arith.constant 0 : i32
    return %arg0, %c0_i32 : i32, i32
  }
}

</mosaic_0001>

<bundles_post_ra>
// kernel: tile.8
= control target key start
LH: loop header
LB: loop body
LE: loop exit
PB: predicated region body
PF: predicated region fallthrough
CT: control target
= control target key end

     0   :  { %s22_s0 = inlined_call_operand.vmem [shape: f32[16], index: 0, kind: input, shape index: {}]   ;;  %s23_s1 = inlined_call_operand.vmem [shape: f32[8,16], index: 1, kind: output, shape index: {}]  }
   0x1   :  { %v4_v0 = vld [vmem:[%s22_s0] ss:$0 sm:$0xff] }
   0x2   :  { %5 = vst [vmem:[%s23_s1] sm:$0xff] %v4_v0 }

// kernel: tile.9
= control target key start
LH: loop header
LB: loop body
LE: loop exit
PB: predicated region body
PF: predicated region fallthrough
CT: control target
= control target key end

     0   :  { %s67_s10 = smov 112   ;;  %s68_s11 = smov 80   ;;  %vm3_vm0 = vcmask 130048   ;;  %vm9_vm1 = vcmask 1048448   ;;  %vm15_vm2 = vcmask 917248   ;;  %vm21_vm3 = vcmask 786048   ;;  %s111_s0 = inlined_call_operand.vmem [shape: f32[8,16], index: 0, kind: input, shape index: {}]   ;;  %s112_s1 = inlined_call_operand.vmem [shape: f32[1,128], index: 1, kind: output, shape index: {}]  }
   0x1   :  { %v53_v0 = vld [vmem:[%s111_s0 + $0x7] sm:$0x1]   ;;  %v55_v1 = vld [vmem:[%s111_s0 + $0x5] sm:$0x1]   ;;  %v54_v2 = vld [vmem:[%s111_s0 + $0x6] sm:$0x1]  }
   0x2   :  { %7 = vrot.lane.b32.xlu0 %v53_v0, %s67_s10  ;;  %19 = vrot.lane.b32.xlu1 %v55_v1, %s68_s11  ;;  %v56_v3 = vld [vmem:[%s111_s0 + $0x4] sm:$0x1]   ;;  %v2_v4 = vld [vmem:[%s111_s0] sm:$0x1]   ;;  %s69_s18 = smov 96   ;;  %s70_s19 = smov 64  }
   0x3   :  { %4 = vst.msk [vmem:[#allocation0] sm:$0x1] %vm3_vm0, %v2_v4   ;;  %v57_v5 = vld [vmem:[%s111_s0 + $0x3] sm:$0x1]   ;;  %v58_v6 = vld [vmem:[%s111_s0 + $0x2] sm:$0x1]  }
   0x4   :  { %s71_s24 = smov 48   ;;  %s72_s25 = smov 32   ;;  %v59_v7 = vld [vmem:[%s111_s0 + $0x1] sm:$0x1]   ;;  %vm27_vm4 = vcmask 654848   ;;  %vm33_vm5 = vcmask 523648  }
   0x5   :  { %s73_s0 = smov 16   ;;  %vm39_vm6 = vcmask 392448   ;;  %vm45_vm7 = vcmask 261248  }
   0x6   :  { %13 = vrot.lane.b32.xlu0 %v54_v2, %s69_s18  ;;  %25 = vrot.lane.b32.xlu1 %v56_v3, %s70_s19 }
   0xa   :  { %31 = vrot.lane.b32.xlu0 %v57_v5, %s71_s24  ;;  %37 = vrot.lane.b32.xlu1 %v58_v6, %s72_s25 }
   0xe   :  { %43 = vrot.lane.b32.xlu0 %v59_v7, %s73_s0 }
  0x74   :  { %v8_v8 = vpop.permute.xlu0 %7   ;;  %v20_v9 = vpop.permute.xlu1 %19  }
  0x75   :  { %10 = vst.msk [vmem:[#allocation0] sm:$0x1] %vm9_vm1, %v8_v8  }
  0x78   :  { %v14_v10 = vpop.permute.xlu0 %13   ;;  %v26_v11 = vpop.permute.xlu1 %25  }
  0x79   :  { %16 = vst.msk [vmem:[#allocation0] sm:$0x1] %vm15_vm2, %v14_v10  }
  0x7a   :  { %22 = vst.msk [vmem:[#allocation0] sm:$0x1] %vm21_vm3, %v20_v9  }
  0x7b   :  { %28 = vst.msk [vmem:[#allocation0] sm:$0x1] %vm27_vm4, %v26_v11  }
  0x7c   :  { %v32_v12 = vpop.permute.xlu0 %31   ;;  %v38_v13 = vpop.permute.xlu1 %37  }
  0x7d   :  { %34 = vst.msk [vmem:[#allocation0] sm:$0x1] %vm33_vm5, %v32_v12  }
  0x7e   :  { %40 = vst.msk [vmem:[#allocation0] sm:$0x1] %vm39_vm6, %v38_v13  }
  0x80   :  { %v44_v14 = vpop.permute.xlu0 %43  }
  0x81   :  { %46 = vst.msk [vmem:[#allocation0] sm:$0x1] %vm45_vm7, %v44_v14  }
  0x88   :  { %v50_v15 = vld [vmem:[#allocation0] sm:$0x1] }
  0x89   :  { %52 = vst [vmem:[%s112_s1] sm:$0x1] %v50_v15 }

// kernel: _forward_impl.1
= control target key start
LH: loop header
LB: loop body
LE: loop exit
PB: predicated region body
PF: predicated region fallthrough
CT: control target
= control target key end

     0   :  { %v186_v0 = vmov 0.0|0.0   ;;  %vm187_vm0 = vmmov 0   ;;  %v188_v4 = vmov 0.0   ;;  %s266_s1 = inlined_call_operand.vmem [shape: f32[128,128], index: 1, kind: input, shape index: {}]   ;;  %s267_s0 = inlined_call_operand.vmem [shape: f32[1,128], index: 0, kind: input, shape index: {}]   ;;  %s268_s2 = inlined_call_operand.vmem [shape: f32[1,128], index: 2, kind: input, shape index: {}]   ;;  %s269_s3 = inlined_call_operand.vmem [shape: f32[1,128], index: 3, kind: output, shape index: {}]  }
   0x1   :  { %159 = vmatprep.subr.bf16.mxu0 %v186_v0  ;;  %v15_v1 = vld [vmem:[%s266_s1] sm:$0xff]  ;;  %v16_v2 = vld [vmem:[%s266_s1 + $0x8] sm:$0xff]  ;;  %v17_v3 = vld [vmem:[%s266_s1 + $0x10] sm:$0xff]  ;;  %156 = vmatprep.mubr.msk.f32.mxu0 %vm187_vm0, %v188_v4 }
   0x2   :  { %v160_v5 = vpack.c.bf16 %v16_v2, %v15_v1  ;;  %v18_v6 = vld [vmem:[%s266_s1 + $0x18] sm:$0xff]  ;;  %v19_v8 = vld [vmem:[%s266_s1 + $0x20] sm:$0xff]  ;;  %v20_v9 = vld [vmem:[%s266_s1 + $0x28] sm:$0xff] }
   0x3   :  { %v163_v7 = vpack.c.bf16 %v18_v6, %v17_v3  ;;  %v166_v10 = vpack.c.bf16 %v20_v9, %v19_v8  ;;  %v21_v11 = vld [vmem:[%s266_s1 + $0x30] sm:$0xff]  ;;  %v22_v12 = vld [vmem:[%s266_s1 + $0x38] sm:$0xff]  ;;  %v23_v14 = vld [vmem:[%s266_s1 + $0x40] sm:$0xff] }
   0x4   :  { %161 = vmatpush3.bf16.msra.mxu0 %v160_v5  ;;  %v169_v13 = vpack.c.bf16 %v22_v12, %v21_v11  ;;  %v24_v15 = vld [vmem:[%s266_s1 + $0x48] sm:$0xff]  ;;  %v25_v17 = vld [vmem:[%s266_s1 + $0x50] sm:$0xff]  ;;  %v26_v18 = vld [vmem:[%s266_s1 + $0x58] sm:$0xff] }
   0x5   :  { %162 = vmatprep.subr.bf16.mxu0 %v186_v0  ;;  %v172_v16 = vpack.c.bf16 %v24_v15, %v23_v14  ;;  %v175_v19 = vpack.c.bf16 %v26_v18, %v25_v17  ;;  %v27_v20 = vld [vmem:[%s266_s1 + $0x60] sm:$0xff]  ;;  %v28_v21 = vld [vmem:[%s266_s1 + $0x68] sm:$0xff]  ;;  %v29_v23 = vld [vmem:[%s266_s1 + $0x70] sm:$0xff] }
   0x6   :  { %v178_v22 = vpack.c.bf16 %v28_v21, %v27_v20  ;;  %v30_v24 = vld [vmem:[%s266_s1 + $0x78] sm:$0xff]  ;;  %v14_v26 = vld [vmem:[%s267_s0] sm:$0x1] }
   0x7   :  { %v181_v25 = vpack.c.bf16 %v30_v24, %v29_v23  ;;  %v31_v27 = vld [vmem:[%s268_s2] sm:$0x1] }
   0x8   :  { %164 = vmatpush3.bf16.msra.mxu0 %v163_v7 }
   0x9   :  { %165 = vmatprep.subr.bf16.mxu0 %v186_v0 }
   0xc   :  { %167 = vmatpush3.bf16.msra.mxu0 %v166_v10 }
   0xd   :  { %168 = vmatprep.subr.bf16.mxu0 %v186_v0 }
  0x10   :  { %170 = vmatpush3.bf16.msra.mxu0 %v169_v13 }
  0x11   :  { %171 = vmatprep.subr.bf16.mxu0 %v186_v0 }
  0x14   :  { %173 = vmatpush3.bf16.msra.mxu0 %v172_v16 }
  0x15   :  { %174 = vmatprep.subr.bf16.mxu0 %v186_v0 }
  0x18   :  { %176 = vmatpush3.bf16.msra.mxu0 %v175_v19 }
  0x19   :  { %177 = vmatprep.subr.bf16.mxu0 %v186_v0 }
  0x1c   :  { %179 = vmatpush3.bf16.msra.mxu0 %v178_v22 }
  0x1d   :  { %180 = vmatprep.subr.bf16.mxu0 %v186_v0 }
  0x20   :  { %182 = vmatpush3.bf16.msra.mxu0 %v181_v25 }
  0x23   :  { %157 = vmatmul.mubr.f32.vlgmr.msra.gmra.mrb[0].mxu0 %v14_v26 }
  0xf6   :  { %v98_v28 = vpop.f32.mrb[0].mxu0 }
  0xf7   :  { %v99_v29 = vadd.f32 %v98_v28, %v31_v27  ;;  %v158_v30 = vpop.f32.mrb[1].mxu0 }
  0xf9   :  { %102 = vst [vmem:[%s269_s3] sm:$0x1] %v99_v29 }

</bundles_post_ra>
